<compile_context>
chip_gen: v5e
topology: v5e:2x2
jax: 0.10.0
libtpu: 0.0.40
codegen_flags: <defaults>
</compile_context>

<pallas_src>
import functools

import jax
import jax.numpy as jnp
from jax.experimental import pallas as pl
from jax.experimental.pallas import tpu as pltpu


def _round_up(x, m):
    return ((x + m - 1) // m) * m


def _cdiv(a, b):
    return -(-a // b)


def _pick_time_tiling(Lout_pad, B, Hw, max_chunk=2048):
    """Pick the output lane-chunk Lc (multiple of 128, >= Hw) and number of chunks."""
    Lc = min(Lout_pad, max_chunk)
    n_chunks = _cdiv(Lout_pad, Lc)
    # Keep >= 2 parallel grid steps alive for dual-TensorCore chips (v7x).
    if B * n_chunks < 2 and Lout_pad >= 256:
        n_chunks = 2
    Lc = max(_round_up(_cdiv(Lout_pad, n_chunks), 128), Hw, 128)
    n_chunks = _cdiv(Lout_pad, Lc)
    return Lc, n_chunks


def _make_downsamp_kernel(Q, Lc):
    """One (batch, output-chunk) step: im2col via Q slab lane-shifts + one MXU matmul."""

    def kernel(w_ref, x_ref, h_ref, y_ref):
        # w_ref : (2*Nmodes, K)            bf16 fused complex block weight, K = 2*Q*sps*Nmodes
        # x_ref : (1, R, Lc)               bf16 polyphase main slab for this chunk, R = 2*sps*Nmodes
        # h_ref : (1, 1, R, Hw)            bf16 halo: next Hw lanes after this chunk
        # y_ref : (1, 2*Nmodes, Lc)        f32  [yr ; yi] stacked on sublanes
        main = x_ref[0]                                       # (R, Lc)
        halo = h_ref[0, 0]                                    # (R, Hw)
        slab = jnp.concatenate([main, halo], axis=-1)         # (R, Lc + Hw)
        # Whole-slab lane shifts: shift q supplies tap k = q*sps + r for sublane (p, r, mi).
        cols = jnp.concatenate([slab[:, q:q + Lc] for q in range(Q)], axis=0)  # (K, Lc)
        # Single bf16 MXU matmul covers real & imag output rows of this chunk.
        y_ref[0] = jnp.dot(w_ref[...], cols, preferred_element_type=jnp.float32)

    return kernel


@functools.partial(jax.jit, static_argnums=(3,))
def downsamp_forward(x, w_real, w_imag, sps):
    """Pallas equivalent of downsamp.forward.

    x       : (B, L, Nmodes) complex64
    w_real  : (Nmodes, Nmodes, taps) float32   (weight of conv_r)
    w_imag  : (Nmodes, Nmodes, taps) float32   (weight of conv_i)
    returns : (B, Lout, Nmodes) complex64, Lout = (L - taps)//sps + 1
    """
    B, L, Nmodes = x.shape
    Nout, Nin, taps = w_real.shape
    assert Nout == Nmodes and Nin == Nmodes
    assert L >= taps

    f32, bf16 = jnp.float32, jnp.bfloat16
    Lout = (L - taps) // sps + 1
    Q = _cdiv(taps, sps)                     # number of slab lane-shifts
    Lq = _cdiv(L, sps)                       # polyphase length
    R = 2 * sps * Nmodes                     # polyphase slab rows (re + im)
    K = 2 * Q * sps * Nmodes                 # im2col rows
    Hw = _round_up(max(Q, 1), 128)           # halo width (lanes), covers the tap overlap
    Lout_pad = _round_up(Lout, 128)
    Lc, n_chunks = _pick_time_tiling(Lout_pad, B, Hw)
    Lout_alloc = n_chunks * Lc

    # ---- polyphase slabs (bf16): row p*(sps*Nmodes)+r*Nmodes+mi, col j = part_p(x)[j*sps+r, mi]
    xr = jnp.real(x).astype(bf16)
    xi = jnp.imag(x).astype(bf16)
    pad_t = Lq * sps - L
    if pad_t:
        xr = jnp.pad(xr, ((0, 0), (0, pad_t), (0, 0)))
        xi = jnp.pad(xi, ((0, 0), (0, pad_t), (0, 0)))

    def poly(a):
        a = a.reshape(B, Lq, sps, Nmodes)
        a = jnp.transpose(a, (0, 2, 3, 1))   # (B, sps, Nmodes, Lq)
        return a.reshape(B, sps * Nmodes, Lq)

    x_poly = jnp.concatenate([poly(xr), poly(xi)], axis=1)       # (B, R, Lq)

    # Pad lanes so both the main slab (n_chunks*Lc) and every chunk's halo stay in bounds.
    Lp_ext = Lout_alloc + Lc                                     # Lc >= Hw, so this covers all halos
    if Lq < Lp_ext:
        x_ext = jnp.pad(x_poly, ((0, 0), (0, 0), (0, Lp_ext - Lq)))
    else:
        x_ext = x_poly[:, :, :Lp_ext]

    x_main = x_ext[:, :, :Lout_alloc]                            # (B, R, n_chunks*Lc)
    halo = x_ext[:, :, Lc:Lc + Lout_alloc]                       # (B, R, n_chunks*Lc), shifted by one chunk
    halo = halo.reshape(B, R, n_chunks, Lc)[..., :Hw]
    halo = jnp.transpose(halo, (0, 2, 1, 3))                     # (B, n_chunks, R, Hw)

    # ---- fused complex block weight, columns in (q, part, r, mi) im2col row order, bf16
    k_idx = jnp.arange(Q)[:, None] * sps + jnp.arange(sps)[None, :]   # (Q, sps), tap k = q*sps + r
    valid = (k_idx < taps).astype(f32)
    k_clamped = jnp.minimum(k_idx, taps - 1)

    def gather_w(w):
        g = w.astype(f32)[:, :, k_clamped] * valid[None, None]   # (Nout, Nin, Q, sps)
        return jnp.transpose(g, (0, 2, 3, 1))                    # (Nout, Q, sps, Nin)

    Gr, Gi = gather_w(w_real), gather_w(w_imag)
    W_re = jnp.stack([Gr, -Gi], axis=2).reshape(Nmodes, K)       # real output rows
    W_im = jnp.stack([Gi, Gr], axis=2).reshape(Nmodes, K)        # imag output rows
    W_big = jnp.concatenate([W_re, W_im], axis=0).astype(bf16)   # (2*Nmodes, K)

    kernel = _make_downsamp_kernel(Q, Lc)
    flops = 8 * B * Nmodes * Nmodes * taps * Lout
    bytes_accessed = (2 * (x_main.size + halo.size + W_big.size)
                      + 4 * B * 2 * Nmodes * Lout_alloc)

    y_out = pl.pallas_call(
        kernel,
        out_shape=jax.ShapeDtypeStruct((B, 2 * Nmodes, Lout_alloc), f32),
        grid=(B, n_chunks),
        in_specs=[
            pl.BlockSpec((2 * Nmodes, K), lambda b, c: (0, 0)),        # weight stays resident
            pl.BlockSpec((1, R, Lc), lambda b, c: (b, 0, c)),          # main slab chunk
            pl.BlockSpec((1, 1, R, Hw), lambda b, c: (b, c, 0, 0)),    # halo for this chunk
        ],
        out_specs=pl.BlockSpec((1, 2 * Nmodes, Lc), lambda b, c: (b, 0, c)),
        compiler_params=pltpu.CompilerParams(
            dimension_semantics=("parallel", "parallel"),
            vmem_limit_bytes=32 * 1024 * 1024),
        cost_estimate=pl.CostEstimate(flops=flops, transcendentals=0,
                                      bytes_accessed=bytes_accessed),
    )(W_big, x_main, halo)

    yr = y_out[:, :Nmodes, :Lout]
    yi = y_out[:, Nmodes:, :Lout]
    y = (yr + 1j * yi).astype(jnp.complex64)       # (B, Nmodes, Lout)
    # TODO(synk): skip this transpose if the downstream consumer accepts (B, Nmodes, Lout).
    return jnp.transpose(y, (0, 2, 1))             # (B, Lout, Nmodes)


if __name__ == "__main__":
    # Module defaults: taps=32, sps=2; use Nmodes=2 (dual-pol), small batch / sequence.
    taps, Nmodes, sps = 32, 2, 2
    B, Lout = 2, 128
    L = taps + sps * (Lout - 1)                    # 286

    key = jax.random.PRNGKey(0)
    k1, k2, k3, k4 = jax.random.split(key, 4)
    x = (jax.random.normal(k1, (B, L, Nmodes), jnp.float32)
         + 1j * jax.random.normal(k2, (B, L, Nmodes), jnp.float32)).astype(jnp.complex64)

    # Deterministic synthetic weights (Conv1d-style uniform bound), not a checkpoint load.
    bound = 1.0 / (Nmodes * taps) ** 0.5
    w_real = jax.random.uniform(k3, (Nmodes, Nmodes, taps), jnp.float32, -bound, bound)
    w_imag = jax.random.uniform(k4, (Nmodes, Nmodes, taps), jnp.float32, -bound, bound)

    y = downsamp_forward(x, w_real, w_imag, sps)
    y = jax.block_until_ready(y)

    # Plain-JAX f32 reference of the same complex strided conv.
    idx = jnp.arange(Lout)[:, None] * sps + jnp.arange(taps)[None, :]

    def ref_conv(a, w):
        win = a[:, idx, :]                          # (B, Lout, taps, Nmodes_in)
        return jnp.einsum('bltm,nmt->bln', win, w)  # (B, Lout, Nmodes_out)

    xre, xim = jnp.real(x), jnp.imag(x)
    y_ref = (ref_conv(xre, w_real) - ref_conv(xim, w_imag)
             + 1j * (ref_conv(xim, w_real) + ref_conv(xre, w_imag)))

    assert y.shape == (B, Lout, Nmodes), y.shape
    err = float(jnp.max(jnp.abs(y - y_ref)))
    # bf16 inputs/weights (f32 accumulate): expected max abs error ~1e-2.
    assert err < 3e-2, f"max abs error too large: {err}"
    print("KERNEL_OK")
</pallas_src>

<mosaic_0001>
module attributes {stable_mosaic.version = 11 : i64} {
  func.func @kernel(%arg0: i32, %arg1: i32, %arg2: memref<4x128xbf16, #tpu.memory_space<vmem>>, %arg3: memref<1x8x128xbf16, #tpu.memory_space<vmem>>, %arg4: memref<1x1x8x128xbf16, #tpu.memory_space<vmem>>, %arg5: memref<1x4x128xf32, #tpu.memory_space<vmem>>) attributes {dimension_semantics = [#tpu.dimension_semantics<parallel>, #tpu.dimension_semantics<parallel>], iteration_bounds = array<i64: 2, 1>, scalar_prefetch = 0 : i64, scratch_operands = 0 : i64, tpu.core_type = #tpu.core_type<tc>, window_params = [{pipeline_mode = #tpu.pipeline_mode<synchronous>, transform_indices = @transform_0, window_bounds = array<i64: 4, 128>}, {transform_indices = @transform_1, window_bounds = array<i64: 1, 8, 128>}, {transform_indices = @transform_2, window_bounds = array<i64: 1, 1, 8, 128>}, {transform_indices = @transform_3, window_bounds = array<i64: 1, 4, 128>}]} {
    %c0 = arith.constant 0 : index
    %c0_0 = arith.constant 0 : index
    %c0_1 = arith.constant 0 : index
    %0 = vector.load %arg3[%c0, %c0_0, %c0_1] : memref<1x8x128xbf16, #tpu.memory_space<vmem>>, vector<1x8x128xbf16>
    %1 = vector.shape_cast %0 : vector<1x8x128xbf16> to vector<8x128xbf16>
    %c0_2 = arith.constant 0 : index
    %c0_3 = arith.constant 0 : index
    %c0_4 = arith.constant 0 : index
    %c0_5 = arith.constant 0 : index
    %2 = vector.load %arg4[%c0_2, %c0_3, %c0_4, %c0_5] : memref<1x1x8x128xbf16, #tpu.memory_space<vmem>>, vector<1x1x8x128xbf16>
    %3 = vector.shape_cast %2 : vector<1x1x8x128xbf16> to vector<8x128xbf16>
    %4 = tpu.concatenate %1, %3 in 1 : vector<8x128xbf16>, vector<8x128xbf16> -> vector<8x256xbf16>
    %5 = vector.extract_strided_slice %4 {offsets = [0, 0], sizes = [8, 128], strides = [1, 1]} : vector<8x256xbf16> to vector<8x128xbf16>
    %6 = vector.extract_strided_slice %4 {offsets = [0, 1], sizes = [8, 128], strides = [1, 1]} : vector<8x256xbf16> to vector<8x128xbf16>
    %7 = vector.extract_strided_slice %4 {offsets = [0, 2], sizes = [8, 128], strides = [1, 1]} : vector<8x256xbf16> to vector<8x128xbf16>
    %8 = vector.extract_strided_slice %4 {offsets = [0, 3], sizes = [8, 128], strides = [1, 1]} : vector<8x256xbf16> to vector<8x128xbf16>
    %9 = vector.extract_strided_slice %4 {offsets = [0, 4], sizes = [8, 128], strides = [1, 1]} : vector<8x256xbf16> to vector<8x128xbf16>
    %10 = vector.extract_strided_slice %4 {offsets = [0, 5], sizes = [8, 128], strides = [1, 1]} : vector<8x256xbf16> to vector<8x128xbf16>
    %11 = vector.extract_strided_slice %4 {offsets = [0, 6], sizes = [8, 128], strides = [1, 1]} : vector<8x256xbf16> to vector<8x128xbf16>
    %12 = vector.extract_strided_slice %4 {offsets = [0, 7], sizes = [8, 128], strides = [1, 1]} : vector<8x256xbf16> to vector<8x128xbf16>
    %13 = vector.extract_strided_slice %4 {offsets = [0, 8], sizes = [8, 128], strides = [1, 1]} : vector<8x256xbf16> to vector<8x128xbf16>
    %14 = vector.extract_strided_slice %4 {offsets = [0, 9], sizes = [8, 128], strides = [1, 1]} : vector<8x256xbf16> to vector<8x128xbf16>
    %15 = vector.extract_strided_slice %4 {offsets = [0, 10], sizes = [8, 128], strides = [1, 1]} : vector<8x256xbf16> to vector<8x128xbf16>
    %16 = vector.extract_strided_slice %4 {offsets = [0, 11], sizes = [8, 128], strides = [1, 1]} : vector<8x256xbf16> to vector<8x128xbf16>
    %17 = vector.extract_strided_slice %4 {offsets = [0, 12], sizes = [8, 128], strides = [1, 1]} : vector<8x256xbf16> to vector<8x128xbf16>
    %18 = vector.extract_strided_slice %4 {offsets = [0, 13], sizes = [8, 128], strides = [1, 1]} : vector<8x256xbf16> to vector<8x128xbf16>
    %19 = vector.extract_strided_slice %4 {offsets = [0, 14], sizes = [8, 128], strides = [1, 1]} : vector<8x256xbf16> to vector<8x128xbf16>
    %20 = vector.extract_strided_slice %4 {offsets = [0, 15], sizes = [8, 128], strides = [1, 1]} : vector<8x256xbf16> to vector<8x128xbf16>
    %21 = tpu.concatenate %5, %6, %7, %8, %9, %10, %11, %12, %13, %14, %15, %16, %17, %18, %19, %20 in 0 : vector<8x128xbf16>, vector<8x128xbf16>, vector<8x128xbf16>, vector<8x128xbf16>, vector<8x128xbf16>, vector<8x128xbf16>, vector<8x128xbf16>, vector<8x128xbf16>, vector<8x128xbf16>, vector<8x128xbf16>, vector<8x128xbf16>, vector<8x128xbf16>, vector<8x128xbf16>, vector<8x128xbf16>, vector<8x128xbf16>, vector<8x128xbf16> -> vector<128x128xbf16>
    %c0_6 = arith.constant 0 : index
    %c0_7 = arith.constant 0 : index
    %22 = vector.load %arg2[%c0_6, %c0_7] : memref<4x128xbf16, #tpu.memory_space<vmem>>, vector<4x128xbf16>
    %cst = arith.constant dense<0.000000e+00> : vector<4x128xf32>
    %23 = tpu.matmul %22, %21, %cst {dimension_numbers = #tpu.dot_dimension_numbers<[1], [0], [0], [1], [0, 0, 1, 1], [], []>} : vector<4x128xbf16>, vector<128x128xbf16>, vector<4x128xf32> -> vector<4x128xf32>
    %c0_8 = arith.constant 0 : index
    %c0_9 = arith.constant 0 : index
    %c0_10 = arith.constant 0 : index
    %24 = vector.load %arg5[%c0_8, %c0_9, %c0_10] : memref<1x4x128xf32, #tpu.memory_space<vmem>>, vector<1x4x128xf32>
    %25 = vector.shape_cast %24 : vector<1x4x128xf32> to vector<4x128xf32>
    %26 = vector.shape_cast %23 : vector<4x128xf32> to vector<1x4x128xf32>
    tpu.vector_store %arg5[%c0_8, %c0_9, %c0_10], %26 {strides = array<i32>} : memref<1x4x128xf32, #tpu.memory_space<vmem>>, vector<1x4x128xf32>,
    return
  }
  func.func @transform_0(%arg0: i32, %arg1: i32) -> (i32, i32) {
    %c0_i32 = arith.constant 0 : i32
    %c0_i32_0 = arith.constant 0 : i32
    %c0_i32_1 = arith.constant 0 : i32
    return %c0_i32, %c0_i32_0 : i32, i32
  }
  func.func @transform_1(%arg0: i32, %arg1: i32) -> (i32, i32, i32) {
    %c0_i32 = arith.constant 0 : i32
    %c0_i32_0 = arith.constant 0 : i32
    return %arg0, %c0_i32, %arg1 : i32, i32, i32
  }
  func.func @transform_2(%arg0: i32, %arg1: i32) -> (i32, i32, i32, i32) {
    %c0_i32 = arith.constant 0 : i32
    %c0_i32_0 = arith.constant 0 : i32
    %c0_i32_1 = arith.constant 0 : i32
    return %arg0, %arg1, %c0_i32, %c0_i32_0 : i32, i32, i32, i32
  }
  func.func @transform_3(%arg0: i32, %arg1: i32) -> (i32, i32, i32) {
    %c0_i32 = arith.constant 0 : i32
    %c0_i32_0 = arith.constant 0 : i32
    return %arg0, %c0_i32, %arg1 : i32, i32, i32
  }
}

</mosaic_0001>

<bundles_post_ra>
// kernel: custom-call.1
= control target key start
LH: loop header
LB: loop body
LE: loop exit
PB: predicated region body
PF: predicated region fallthrough
CT: control target
= control target key end

     0   :  { %s56_s0 = inlined_call_operand.hbm [shape: c64[2,286,2], index: 0, kind: input, shape index: {}]   ;;  %s57_s1 = inlined_call_operand.vmem [shape: f32[2,286,2], index: 1, kind: output, shape index: {}]  }
   0x1   :  { %s2_s8 = scalar_lea.hbm %s56_s0, 12 }
   0x2   :  { %3 = vsyncpa [#allocation0], 0  ;;  %s5_s9 = sshll.u32 %s2_s8, 4  ;;  %s7_s12 = sshll.u32 %s57_s1, 4  ;;  %s6_s9 = int_to_ptr.hbm [resolvable:$true] %s5_s9  ;;  %s8_s12 = int_to_ptr.vmem [resolvable:$true] %s7_s12 }
   0x3   :  { %10 = dma.hbm_to_vmem [thread:$0]  %s6_s9, 192, %s8_s12, [#allocation0] }
   0x4   :  { %38 = dma.done.wait [#allocation0], 192  }
   0x5   :  { %39 = vsyncadd [#allocation0], 4294967104 }
   0x6   :  { %13 = vsyncpa [#allocation0], 1 }

// kernel: custom-call
= control target key start
LH: loop header
LB: loop body
LE: loop exit
PB: predicated region body
PF: predicated region fallthrough
CT: control target
= control target key end

     0   :  { %2 = vsyncpa [#allocation0], 0  ;;  %s55_s0 = inlined_call_operand.hbm [shape: c64[2,286,2], index: 0, kind: input, shape index: {}]   ;;  %s56_s1 = inlined_call_operand.vmem [shape: f32[2,286,2], index: 1, kind: output, shape index: {}]  }
   0x1   :  { %s4_s8 = sshll.u32 %s55_s0, 4  ;;  %s6_s11 = sshll.u32 %s56_s1, 4  ;;  %s5_s8 = int_to_ptr.hbm [resolvable:$true] %s4_s8  ;;  %s7_s11 = int_to_ptr.vmem [resolvable:$true] %s6_s11 }
   0x2   :  { %9 = dma.hbm_to_vmem [thread:$0]  %s5_s8, 192, %s7_s11, [#allocation0] }
   0x3   :  { %37 = dma.done.wait [#allocation0], 192  }
   0x4   :  { %38 = vsyncadd [#allocation0], 4294967104 }
   0x5   :  { %12 = vsyncpa [#allocation0], 1 }

// kernel: custom-call.2
= control target key start
LH: loop header
LB: loop body
LE: loop exit
PB: predicated region body
PF: predicated region fallthrough
CT: control target
= control target key end

     0   :  { %s105_s0 = inlined_call_operand.vmem [shape: f32[2,128,2], index: 0, kind: input, shape index: {}]   ;;  %s106_s1 = inlined_call_operand.vmem [shape: f32[2,128,2], index: 1, kind: input, shape index: {}]   ;;  %s107_s2 = inlined_call_operand.hbm [shape: c64[2,128,2], index: 2, kind: output, shape index: {}]  }
   0x1   :  { %s3_s11 = scalar_lea.hbm %s107_s2, 4 }
   0x2   :  { %4 = vsyncpa [#allocation0], 0  ;;  %s6_s14 = sshll.u32 %s105_s0, 4  ;;  %s8_s17 = sshll.u32 %s107_s2, 4  ;;  %s7_s14 = int_to_ptr.vmem [resolvable:$true] %s6_s14  ;;  %s9_s17 = int_to_ptr.hbm [resolvable:$true] %s8_s17 }
   0x3   :  { %11 = dma.vmem_to_hbm [thread:$0]  %s7_s14, 64, %s9_s17, [#allocation0] }
   0x4   :  { %74 = dma.done.wait [#allocation0], 64  }
   0x5   :  { %75 = vsyncadd [#allocation0], 4294967232 }
   0x6   :  { %14 = vsyncpa [#allocation0], 1 }
   0x7   :  { %15 = vsyncpa [#allocation1], 0  ;;  %s17_s20 = sshll.u32 %s106_s1, 4  ;;  %s19_s21 = sshll.u32 %s3_s11, 4  ;;  %s18_s20 = int_to_ptr.vmem [resolvable:$true] %s17_s20  ;;  %s20_s21 = int_to_ptr.hbm [resolvable:$true] %s19_s21 }
   0x8   :  { %22 = dma.vmem_to_hbm [thread:$0]  %s18_s20, 64, %s20_s21, [#allocation1] }
   0x9   :  { %76 = dma.done.wait [#allocation1], 64  }
   0xa   :  { %77 = vsyncadd [#allocation1], 4294967232 }
   0xb   :  { %25 = vsyncpa [#allocation1], 1 }

// kernel: downsamp_forward.1
= control target key start
LH: loop header
LB: loop body
LE: loop exit
PB: predicated region body
PF: predicated region fallthrough
CT: control target
= control target key end

     0   :  { %s566_s12 = smov 0   ;;  %s568_s13 = smov 0   ;;  %s629_s0 = inlined_call_operand.vmem [shape: bf16[4,128], index: 0, kind: input, shape index: {}]   ;;  %s630_s1 = inlined_call_operand.vmem [shape: bf16[2,8,128], index: 1, kind: input, shape index: {}]   ;;  %s631_s2 = inlined_call_operand.vmem [shape: bf16[2,1,8,128], index: 2, kind: input, shape index: {}]   ;;  %s632_s3 = inlined_call_operand.vmem [shape: f32[2,4,128], index: 3, kind: output, shape index: {}]  }
   0x1   :  { %s570_s14 = smov 0  }
   0x2 LB: > { %s25_s15 = sadd.s32 1, %s525_s13  ;;  %p462_p0 = scmp.ge.s32.totalorder %s529_s14, 1  ;;  %s529_s14 = sphi %s570_s14, %s13_s14   ;;  %s525_s13 = sphi %s568_s13, %s634_s13   ;;  %s521_s12 = sphi %s566_s12, %s633_s12  }
   0x3   : > { %p27_p1 = scmp.ge.s32.totalorder %s25_s15, 2  ;;  %p169_p2 = scmp.lt.s32.totalorder %s529_s14, 3 }
   0x5   : > { %s636_s15 = smov (%p27_p1, %s25_s15), 0  ;;  %p170_p3 = pnand %p462_p0, %p169_p2 }
   0x6   : > { %p204_p4 = scmp.lt.s32.totalorder (!%p170_p3), %s521_s12, 1  ;;  %s531_s20 = smov (!%p170_p3), 114  }
   0x7   : > { %173 = sbr.rel (%p170_p3) target bundleno = 346 (0x15a), region = 32  ;;  %s532_s24 = smov (!%p170_p3), 116  }
   0x8   : > { %s533_s25 = smov (!%p170_p3), 113   ;;  %s534_s26 = smov (!%p170_p3), 115  }
   0x9   : > { %s535_s27 = smov (!%p170_p3), 118   ;;  %s536_s28 = smov (!%p170_p3), 117  }
   0xa   : > { %s537_s29 = smov (!%p170_p3), 120   ;;  %s538_s30 = smov (!%p170_p3), 119  }
   0xb   : > { %s539_s4 = smov (!%p170_p3), 122   ;;  %s540_s5 = smov (!%p170_p3), 121  }
   0xc   : > { %s638_s12 = smov (!%p204_p4, %s521_s12), 1  ;;  %s541_s6 = smov 124   ;;  %vm313_vm0 = vcmask 932864   ;;  %vm319_vm1 = vcmask 924672   ;;  %vm321_vm2 = vcmask 1043456   ;;  %vm301_vm3 = vcmask 949248  }
   0xd   : > { %s584_s16 = sshll.u32 %s638_s12, 2  ;;  %s542_s7 = smov 123   ;;  %vm307_vm4 = vcmask 941056   ;;  %vm289_vm5 = vcmask 965632   ;;  %vm295_vm6 = vcmask 957440   ;;  %vm277_vm7 = vcmask 982016  }
   0xe   : > { %s210_s19 = scalar_lea.vmem %s630_s1, %s584_s16  ;;  %s217_s23 = scalar_lea.vmem %s631_s2, %s584_s16  ;;  %vm283_vm8 = vcmask 973824   ;;  %vm265_vm9 = vcmask 998400   ;;  %vm271_vm10 = vcmask 990208   ;;  %vm253_vm11 = vcmask 1014784   ;;  %v354_v57 = vld [vmem:[%s629_s0] sm:$0x3] }
   0xf   : > { %v590_v0 = vld [vmem:[%s210_s19] sm:$0xf]  ;;  %s543_s8 = smov 126   ;;  %s544_s9 = smov 125   ;;  %vm259_vm12 = vcmask 1006592   ;;  %vm241_vm13 = vcmask 1031168  }
  0x10   : > { %309 = vrot.lane.b32.xlu0 %v590_v0, %s531_s20  ;;  %v229_v1 = vrot.slane %v590_v0, 4  ;;  %297 = vrot.lane.b32.xlu2 %v590_v0, %s532_s24  ;;  %v226_v2 = vld [vmem:[%s217_s23] sm:$0xf]  ;;  %s545_s10 = smov 127   ;;  %vm247_vm14 = vcmask 1022976   ;;  %vm235_vm15 = vcmask 1039360   ;;  %s224_s19 = scalar_lea.vmem %s632_s3, %s584_s16 }
  0x11   : > { %v230_v3 = vrot.slane %v226_v2, 4 }
  0x12   : > { %315 = vrot.lane.b32.xlu1 %v229_v1, %s533_s25 }
  0x18   : > { %311 = vrot.lane.b32.xlu0 %v226_v2, %s531_s20  ;;  %299 = vrot.lane.b32.xlu2 %v226_v2, %s532_s24 }
  0x1a   : > { %317 = vrot.lane.b32.xlu1 %v230_v3, %s533_s25 }
  0x20   : > { %303 = vrot.lane.b32.xlu0 %v229_v1, %s534_s26  ;;  %285 = vrot.lane.b32.xlu2 %v590_v0, %s535_s27 }
  0x22   : > { %305 = vrot.lane.b32.xlu1 %v230_v3, %s534_s26 }
  0x28   : > { %287 = vrot.lane.b32.xlu0 %v226_v2, %s535_s27  ;;  %293 = vrot.lane.b32.xlu2 %v230_v3, %s536_s28 }
  0x2a   : > { %291 = vrot.lane.b32.xlu1 %v229_v1, %s536_s28 }
  0x30   : > { %273 = vrot.lane.b32.xlu0 %v590_v0, %s537_s29  ;;  %279 = vrot.lane.b32.xlu2 %v229_v1, %s538_s30 }
  0x32   : > { %275 = vrot.lane.b32.xlu1 %v226_v2, %s537_s29 }
  0x38   : > { %281 = vrot.lane.b32.xlu0 %v230_v3, %s538_s30  ;;  %263 = vrot.lane.b32.xlu2 %v226_v2, %s539_s4 }
  0x3a   : > { %261 = vrot.lane.b32.xlu1 %v590_v0, %s539_s4 }
  0x40   : > { %267 = vrot.lane.b32.xlu0 %v229_v1, %s540_s5  ;;  %249 = vrot.lane.b32.xlu2 %v590_v0, %s541_s6 }
  0x42   : > { %269 = vrot.lane.b32.xlu1 %v230_v3, %s540_s5 }
  0x48   : > { %251 = vrot.lane.b32.xlu0 %v226_v2, %s541_s6  ;;  %257 = vrot.lane.b32.xlu2 %v230_v3, %s542_s7 }
  0x4a   : > { %255 = vrot.lane.b32.xlu1 %v229_v1, %s542_s7 }
  0x50   : > { %237 = vrot.lane.b32.xlu0 %v590_v0, %s543_s8  ;;  %243 = vrot.lane.b32.xlu2 %v229_v1, %s544_s9 }
  0x52   : > { %239 = vrot.lane.b32.xlu1 %v226_v2, %s543_s8 }
  0x58   : > { %245 = vrot.lane.b32.xlu0 %v230_v3, %s544_s9  ;;  %233 = vrot.lane.b32.xlu2 %v230_v3, %s545_s10 }
  0x5a   : > { %231 = vrot.lane.b32.xlu1 %v229_v1, %s545_s10 }
  0x6a   : > { %v298_v4 = vpop.permute.xlu2 %297 }
  0x72   : > { %v300_v5 = vpop.permute.xlu2 %299 }
  0x73   : > { %v302_v17 = vsel %vm301_vm3, %v298_v4, %v300_v5 }
  0x7a   : > { %v286_v8 = vpop.permute.xlu2 %285 }
  0x82   : > { %v310_v6 = vpop.permute.xlu0 %309  ;;  %v294_v14 = vpop.permute.xlu2 %293 }
  0x84   : > { %v316_v7 = vpop.permute.xlu1 %315 }
  0x8a   : > { %v312_v9 = vpop.permute.xlu0 %311  ;;  %v280_v21 = vpop.permute.xlu2 %279 }
  0x8b   : > { %v314_v11 = vsel %vm313_vm0, %v310_v6, %v312_v9 }
  0x8c   : > { %v318_v10 = vpop.permute.xlu1 %317 }
  0x8d   : > { %v320_v12 = vsel %vm319_vm1, %v316_v7, %v318_v10 }
  0x8e   : > { %v352_v13 = vsel %vm321_vm2, %v314_v11, %v320_v12 }
  0x8f   : > { %355 = vmatpush.bf16.msra.mxu0 %v352_v13 }
  0x92   : > { %v304_v15 = vpop.permute.xlu0 %303  ;;  %v264_v28 = vpop.permute.xlu2 %263 }
  0x94   : > { %v306_v16 = vpop.permute.xlu1 %305 }
  0x95   : > { %v308_v18 = vsel %vm307_vm4, %v304_v15, %v306_v16 }
  0x96   : > { %v348_v19 = vsel %vm321_vm2, %v302_v17, %v308_v18 }
  0x97   : > { %356 = vmatpush.bf16.msra.mxu0 %v348_v19 }
  0x9a   : > { %v288_v20 = vpop.permute.xlu0 %287  ;;  %v250_v34 = vpop.permute.xlu2 %249 }
  0x9b   : > { %v290_v23 = vsel %vm289_vm5, %v286_v8, %v288_v20 }
  0x9c   : > { %v292_v22 = vpop.permute.xlu1 %291 }
  0x9d   : > { %v296_v24 = vsel %vm295_vm6, %v292_v22, %v294_v14 }
  0x9e   : > { %v344_v25 = vsel %vm321_vm2, %v290_v23, %v296_v24 }
  0x9f   : > { %357 = vmatpush.bf16.msra.mxu0 %v344_v25 }
  0xa2   : > { %v274_v26 = vpop.permute.xlu0 %273  ;;  %v258_v40 = vpop.permute.xlu2 %257 }
  0xa4   : > { %v276_v27 = vpop.permute.xlu1 %275 }
  0xa5   : > { %v278_v30 = vsel %vm277_vm7, %v274_v26, %v276_v27 }
  0xaa   : > { %v282_v29 = vpop.permute.xlu0 %281  ;;  %v244_v46 = vpop.permute.xlu2 %243 }
  0xab   : > { %v284_v31 = vsel %vm283_vm8, %v280_v21, %v282_v29 }
  0xac   : > { %v262_v32 = vpop.permute.xlu1 %261  ;;  %v340_v33 = vsel %vm321_vm2, %v278_v30, %v284_v31 }
  0xad   : > { %358 = vmatpush.bf16.msra.mxu0 %v340_v33  ;;  %v266_v37 = vsel %vm265_vm9, %v262_v32, %v264_v28 }
  0xb2   : > { %v268_v35 = vpop.permute.xlu0 %267  ;;  %v234_v50 = vpop.permute.xlu2 %233 }
  0xb4   : > { %v270_v36 = vpop.permute.xlu1 %269 }
  0xb5   : > { %v272_v38 = vsel %vm271_vm10, %v268_v35, %v270_v36 }
  0xb6   : > { %v336_v39 = vsel %vm321_vm2, %v266_v37, %v272_v38 }
  0xb7   : > { %359 = vmatpush.bf16.msra.mxu0 %v336_v39 }
  0xba   : > { %v252_v41 = vpop.permute.xlu0 %251 }
  0xbb   : > { %v254_v43 = vsel %vm253_vm11, %v250_v34, %v252_v41 }
  0xbc   : > { %v256_v42 = vpop.permute.xlu1 %255 }
  0xbd   : > { %v260_v44 = vsel %vm259_vm12, %v256_v42, %v258_v40 }
  0xbe   : > { %v332_v45 = vsel %vm321_vm2, %v254_v43, %v260_v44 }
  0xbf   : > { %360 = vmatpush.bf16.msra.mxu0 %v332_v45 }
  0xc2   : > { %v238_v47 = vpop.permute.xlu0 %237 }
  0xc4   : > { %v240_v48 = vpop.permute.xlu1 %239 }
  0xc5   : > { %v242_v51 = vsel %vm241_vm13, %v238_v47, %v240_v48 }
  0xca   : > { %v246_v49 = vpop.permute.xlu0 %245 }
  0xcb   : > { %v248_v52 = vsel %vm247_vm14, %v244_v46, %v246_v49 }
  0xcc   : > { %v328_v53 = vsel %vm321_vm2, %v242_v51, %v248_v52  ;;  %v232_v54 = vpop.permute.xlu1 %231 }
  0xcd   : > { %361 = vmatpush.bf16.msra.mxu0 %v328_v53  ;;  %v236_v55 = vsel %vm235_vm15, %v232_v54, %v234_v50 }
  0xce   : > { %v324_v56 = vsel %vm321_vm2, %v590_v0, %v236_v55 }
  0xd1   : > { %362 = vmatpush.bf16.msra.mxu0 %v324_v56 }
  0xd4   : > { %363 = vmatmul.bf16.vlgmr.msra.gmra.mxu0 %v354_v57 }
 0x151   : > { %v364_v58 = vpop.f32.mrf.mxu0 }
 0x152   : > { %368 = vst [vmem:[%s224_s19] sm:$0xf] %v364_v58 }
 0x159   : > { %v366_v59 = vpop.f32.mrf.mxu0 }
 0x15a PF: > { %s13_s14 = sadd.s32 1, %s529_s14   ;;  %s633_s12 = smov %s525_s13 }
 0x15b   : > { %p10_p5 = scmp.ge.s32.totalorder %s13_s14, 4   ;;  %s634_s13 = smov %s636_s15 }
 0x15d   :  { %12 = sbr.rel (!%p10_p5) target bundleno = 2 (0x2), region = 65 }

</bundles_post_ra>
